<compile_context>
chip_gen: v5e
topology: v5e:2x2
jax: 0.10.0
libtpu: 0.0.40
codegen_flags: <defaults>
</compile_context>

<pallas_src>
import jax
import jax.numpy as jnp
from jax.experimental import pallas as pl
from jax.experimental.pallas import tpu as pltpu


def _rmsnorm_kernel(eps, cast_before_scale, weight_dtype):
    def kernel(x_ref, w_ref, o_ref):
        # f32 accumulation path (correct on v5e's no-bf16 VPU as well).
        x = x_ref[...].astype(jnp.float32)
        var = jnp.mean(x * x, axis=-1, keepdims=True)
        inv = jax.lax.rsqrt(var + eps)          # EUP op; effectively free slot
        y = x * inv
        if cast_before_scale:
            # PyTorch: x = x.to(weight.dtype); return weight * x   (half weights)
            y = y.astype(weight_dtype)
            o_ref[...] = (w_ref[...].astype(weight_dtype) * y).astype(o_ref.dtype)
        else:
            o_ref[...] = (w_ref[...].astype(jnp.float32) * y).astype(o_ref.dtype)
    return kernel


def _vmem_capacity_bytes():
    try:
        return int(pltpu.get_tpu_info().vmem_capacity_bytes)
    except Exception:
        return 64 << 20   # conservative (v7x per-TC VMEM)


def _sublane_align(*dtypes):
    """Sublane packing granularity: 8 for 32-bit, 16 for 16-bit, 32 for 8-bit."""
    a = 8
    for dt in dtypes:
        a = max(a, 32 // max(jnp.dtype(dt).itemsize, 1))
    return a


def _pick_row_tile(rows, dim, in_itemsize, out_itemsize, align,
                   block_budget_bytes, max_tile=4096):
    """Largest aligned row tile whose footprint (double-buffered in + out blocks
    PLUS the materialized f32 upcast/normalized temps) fits the budget.  If the
    budgeted tile doesn't divide `rows`, snap down to the largest aligned
    divisor of `rows` that is at least half the budgeted tile (full blocks,
    dense stores); otherwise keep the budgeted tile and rely on Pallas' masked
    partial last block (no wrapper-side padding either way)."""
    # 2x in + 2x out (double buffering) + ~2 x f32 temps (upcast x, normalized y)
    per_row = dim * (2 * in_itemsize + 2 * out_itemsize + 8)
    tile = block_budget_bytes // max(per_row, 1)
    tile = min(tile, max_tile, max(rows, align))
    tile = max((tile // align) * align, align)

    if rows % tile != 0:
        t = tile
        while t >= align:
            if rows % t == 0:
                break
            t -= align
        if t >= align and rows % t == 0 and 2 * t >= tile:
            tile = t
    return int(tile)


def t5_layer_norm(x, weight, eps=1e-6, *, row_tile=None, out_dtype=None,
                  scale_in_f32=False):
    """RMS-normalize `x` along its last dim and scale by `weight` (shape (dim,)).

    out_dtype: optional override of the output dtype (e.g. bf16 for bf16
      consumers with an fp32 weight -- cuts writeback bytes).  Default follows
      PyTorch: weight dtype for half-precision weights, else f32.
    scale_in_f32: do the weight multiply in f32 and cast once at the store
      (avoids bf16 VALU emulation on v5e; changes rounding vs PyTorch's
      cast-before-scale, so off by default).
    """
    orig_shape = x.shape
    dim = orig_shape[-1]
    rows = 1
    for s in orig_shape[:-1]:
        rows *= s

    x2d = x.reshape(rows, dim)
    w2d = weight.reshape(1, dim)

    half_weight = weight.dtype in (jnp.bfloat16, jnp.float16)
    if out_dtype is None:
        out_dtype = weight.dtype if half_weight else jnp.float32

    in_itemsize = jnp.dtype(x.dtype).itemsize
    out_itemsize = jnp.dtype(out_dtype).itemsize
    align = _sublane_align(x.dtype, out_dtype)

    vmem_cap = _vmem_capacity_bytes()
    # ~3/8 of VMEM for the pipelined io blocks: ~24 MiB on v7x, ~48 MiB on v5e/v6e.
    block_budget = (vmem_cap // 8) * 3

    if row_tile is None:
        row_tile = _pick_row_tile(rows, dim, in_itemsize, out_itemsize,
                                  align, block_budget)
    row_tile = max((int(row_tile) // 8) * 8, 8)

    grid = (pl.cdiv(rows, row_tile),)

    # VMEM budget: double-buffered in + out blocks + f32 temps + weight + headroom.
    block_bytes = row_tile * dim * (in_itemsize + out_itemsize) * 2
    temp_bytes = row_tile * dim * 4 * 2
    weight_bytes = dim * jnp.dtype(weight.dtype).itemsize * 2
    required = block_bytes + temp_bytes + weight_bytes + (2 << 20)
    vmem_limit = int(min(max(required, 8 << 20), vmem_cap - (4 << 20)))

    cost = pl.CostEstimate(
        flops=4 * rows * dim,
        transcendentals=rows,
        bytes_accessed=rows * dim * (in_itemsize + out_itemsize)
        + dim * jnp.dtype(weight.dtype).itemsize,
    )

    cast_before_scale = half_weight and not scale_in_f32

    # TODO(synk): if dim % 128 != 0 in production, pad the feature dim in the
    # wrapper (with a corrected mean denominator) to keep the store lane-dense.
    out = pl.pallas_call(
        _rmsnorm_kernel(eps, cast_before_scale, weight.dtype),
        out_shape=jax.ShapeDtypeStruct((rows, dim), out_dtype),
        grid_spec=pltpu.PrefetchScalarGridSpec(
            num_scalar_prefetch=0,
            grid=grid,
            in_specs=[
                pl.BlockSpec((row_tile, dim), lambda i: (i, 0)),
                pl.BlockSpec((1, dim), lambda i: (0, 0)),
            ],
            out_specs=pl.BlockSpec((row_tile, dim), lambda i: (i, 0)),
        ),
        compiler_params=pltpu.CompilerParams(
            dimension_semantics=("parallel",),
            vmem_limit_bytes=vmem_limit,
        ),
        cost_estimate=cost,
    )(x2d, w2d)

    return out.reshape(orig_shape[:-1] + (dim,))


if __name__ == "__main__":
    key = jax.random.PRNGKey(0)
    batch, seq, hidden = 2, 8, 32
    x = jax.random.normal(key, (batch, seq, hidden), dtype=jnp.float32)

    # Deterministic parameter init: nn.Parameter(torch.ones(dim))
    weight = jnp.ones((hidden,), dtype=jnp.float32)
    eps = 1e-6

    y = t5_layer_norm(x, weight, eps)
    jax.block_until_ready(y)

    # Reference check in plain JAX (same math as T5LayerNorm._forward)
    xf = x.astype(jnp.float32)
    var = jnp.mean(xf * xf, axis=-1, keepdims=True)
    ref = weight * (x * jax.lax.rsqrt(var + eps))
    assert y.shape == x.shape
    assert jnp.allclose(y, ref, atol=1e-5, rtol=1e-5), "mismatch vs reference"

    # Exercise the partial-last-block path (rows=15 not divisible by row_tile=8)
    # and the half-precision-weight path (PyTorch's cast-before-scale ordering).
    x_odd = jax.random.normal(jax.random.PRNGKey(1), (3, 5, hidden), jnp.float32)
    w_bf16 = jnp.ones((hidden,), dtype=jnp.bfloat16)
    y_odd = t5_layer_norm(x_odd, w_bf16, eps, row_tile=8)
    jax.block_until_ready(y_odd)
    var_o = jnp.mean(x_odd * x_odd, axis=-1, keepdims=True)
    ref_o = (w_bf16 * (x_odd * jax.lax.rsqrt(var_o + eps)).astype(jnp.bfloat16))
    assert y_odd.dtype == jnp.bfloat16
    assert jnp.allclose(y_odd.astype(jnp.float32), ref_o.astype(jnp.float32),
                        atol=2e-2, rtol=2e-2), "mismatch vs bf16 reference"

    # Exercise the out_dtype override + f32-scale opt-in paths.
    x_bf = x.astype(jnp.bfloat16)
    y_bf = t5_layer_norm(x_bf, weight, eps, out_dtype=jnp.bfloat16,
                         scale_in_f32=True)
    jax.block_until_ready(y_bf)
    xb32 = x_bf.astype(jnp.float32)
    var_b = jnp.mean(xb32 * xb32, axis=-1, keepdims=True)
    ref_b = (weight * (xb32 * jax.lax.rsqrt(var_b + eps))).astype(jnp.bfloat16)
    assert y_bf.dtype == jnp.bfloat16
    assert jnp.allclose(y_bf.astype(jnp.float32), ref_b.astype(jnp.float32),
                        atol=2e-2, rtol=2e-2), "mismatch vs bf16-out reference"

    print("KERNEL_OK")
</pallas_src>

<mosaic_0001>
module attributes {stable_mosaic.version = 11 : i64} {
  func.func @kernel(%arg0: i32, %arg1: memref<16x32xf32, #tpu.memory_space<vmem>>, %arg2: memref<1x32xf32, #tpu.memory_space<vmem>>, %arg3: memref<16x32xf32, #tpu.memory_space<vmem>>) attributes {dimension_semantics = [#tpu.dimension_semantics<parallel>], iteration_bounds = array<i64: 1>, scalar_prefetch = 0 : i64, scratch_operands = 0 : i64, tpu.core_type = #tpu.core_type<tc>, window_params = [{transform_indices = @transform_0, window_bounds = array<i64: 16, 32>}, {pipeline_mode = #tpu.pipeline_mode<synchronous>, transform_indices = @transform_1, window_bounds = array<i64: 1, 32>}, {transform_indices = @transform_2, window_bounds = array<i64: 16, 32>}]} {
    %c0 = arith.constant 0 : index
    %c0_0 = arith.constant 0 : index
    %0 = vector.load %arg1[%c0, %c0_0] : memref<16x32xf32, #tpu.memory_space<vmem>>, vector<16x32xf32>
    %1 = arith.mulf %0, %0 : vector<16x32xf32>
    %cst = arith.constant dense<0.000000e+00> : vector<16xf32>
    %2 = vector.multi_reduction <add>, %1, %cst [1] : vector<16x32xf32> to vector<16xf32>
    %3 = vector.shape_cast %2 : vector<16xf32> to vector<16x1xf32>
    %cst_1 = arith.constant 3.200000e+01 : f32
    %4 = vector.broadcast %cst_1 : f32 to vector<16x1xf32>
    %5 = arith.divf %3, %4 : vector<16x1xf32>
    %cst_2 = arith.constant 9.99999997E-7 : f32
    %6 = vector.broadcast %cst_2 : f32 to vector<16x1xf32>
    %7 = arith.addf %5, %6 : vector<16x1xf32>
    %8 = math.rsqrt %7 : vector<16x1xf32>
    %9 = vector.broadcast %8 : vector<16x1xf32> to vector<16x32xf32>
    %10 = arith.mulf %0, %9 : vector<16x32xf32>
    %c0_3 = arith.constant 0 : index
    %c0_4 = arith.constant 0 : index
    %11 = vector.load %arg2[%c0_3, %c0_4] : memref<1x32xf32, #tpu.memory_space<vmem>>, vector<1x32xf32>
    %12 = vector.broadcast %11 : vector<1x32xf32> to vector<16x32xf32>
    %13 = arith.mulf %12, %10 : vector<16x32xf32>
    %c0_5 = arith.constant 0 : index
    %c0_6 = arith.constant 0 : index
    %14 = vector.load %arg3[%c0_5, %c0_6] : memref<16x32xf32, #tpu.memory_space<vmem>>, vector<16x32xf32>
    tpu.vector_store %arg3[%c0_5, %c0_6], %13 {strides = array<i32>} : memref<16x32xf32, #tpu.memory_space<vmem>>, vector<16x32xf32>,
    return
  }
  func.func @transform_0(%arg0: i32) -> (i32, i32) {
    %c0_i32 = arith.constant 0 : i32
    %c0_i32_0 = arith.constant 0 : i32
    return %arg0, %c0_i32 : i32, i32
  }
  func.func @transform_1(%arg0: i32) -> (i32, i32) {
    %c0_i32 = arith.constant 0 : i32
    %c0_i32_0 = arith.constant 0 : i32
    %c0_i32_1 = arith.constant 0 : i32
    return %c0_i32, %c0_i32_0 : i32, i32
  }
  func.func @transform_2(%arg0: i32) -> (i32, i32) {
    %c0_i32 = arith.constant 0 : i32
    %c0_i32_0 = arith.constant 0 : i32
    return %arg0, %c0_i32 : i32, i32
  }
}

</mosaic_0001>

<bundles_post_ra>
// kernel: tpu_custom_call.1
= control target key start
LH: loop header
LB: loop body
LE: loop exit
PB: predicated region body
PF: predicated region fallthrough
CT: control target
= control target key end

     0   :  { %7 = vsyncpa [#allocation3], 0  ;;  %s245_s0 = inlined_call_operand.hbm [shape: f32[16,32], index: 0, kind: input, shape index: {}]   ;;  %s246_s1 = inlined_call_operand.hbm [shape: f32[1,32], index: 1, kind: input, shape index: {}]   ;;  %s247_s2 = inlined_call_operand.hbm [shape: f32[16,32], index: 2, kind: output, shape index: {}]  }
   0x1   :  { %8 = vsyncpa [#allocation6], 0 }
   0x2   :  { %9 = vsyncpa [#allocation4], 0  ;;  %s14_s11 = sshll.u32 %s245_s0, 4  ;;  %s205_s12 = smov [#allocation2]   ;;  %s15_s11 = int_to_ptr.hbm [resolvable:$true] %s14_s11 }
   0x3   :  { %s16_s13 = sshll.u32 %s205_s12, 4  ;;  %s28_s16 = sshll.u32 %s246_s1, 4  ;;  %s17_s13 = int_to_ptr.vmem [resolvable:$true] %s16_s13  ;;  %s29_s16 = int_to_ptr.hbm [resolvable:$true] %s28_s16 }
   0x4   :  { %s206_s17 = smov 128   ;;  %s207_s18 = smov 8  }
   0x5   :  { %22 = dma.hbm_to_vmem [thread:$0]  %s15_s11, 256, %s17_s13, [#allocation3], %s206_s17, %s206_s17, %s207_s18  }
   0x6   :  { %s208_s19 = smov [#allocation5]  }
   0x7   :  { %s30_s20 = sshll.u32 %s208_s19, 4  ;;  %s31_s20 = int_to_ptr.vmem [resolvable:$true] %s30_s20 }
   0x8   :  { %33 = dma.hbm_to_vmem [thread:$0]  %s29_s16, 16, %s31_s20, [#allocation6]  }
   0x9   :  { %199 = dma.done.wait [#allocation3], 256  }
   0xa   :  { %200 = vsyncadd [#allocation3], 4294967040 }
   0xb   :  { %201 = dma.done.wait [#allocation6], 16  }
   0xc   :  { %202 = vsyncadd [#allocation6], 4294967280  ;;  %v42_v0 = vld [vmem:[#allocation2] sm:$0xff]  ;;  %vm46_vm0 = vcmask 261120   ;;  %v43_v2 = vld [vmem:[#allocation2 + $0x8] sm:$0xff]  ;;  %v209_v6 = vmov 32.0  }
   0xd   :  { %v44_v1 = vmul.f32 %v42_v0, %v42_v0  ;;  %v45_v4 = vmul.f32 %v43_v2, %v43_v2  ;;  %121 = vrcp.f32 %v209_v6  ;;  %v120_v27 = vld [vmem:[#allocation5] ss:$0 sm:$0xff]  ;;  %s210_s0 = smov [#allocation7]   ;;  %s100_s23 = sshll.u32 %s247_s2, 4  ;;  %s101_s23 = int_to_ptr.hbm [resolvable:$true] %s100_s23 }
   0xe   :  { %s98_s1 = sshll.u32 %s210_s0, 4  ;;  %s99_s1 = int_to_ptr.vmem [resolvable:$true] %s98_s1 }
   0xf   :  { %v47_v3 = vsel %vm46_vm0, %v44_v1, 0.0  ;;  %v50_v5 = vsel %vm46_vm0, %v45_v4, 0.0 }
  0x10   :  { %48 = vadd.xlane.f32.xlu0 %v47_v3 }
  0x13   :  { %v122_v7 = vpop.eup %121 }
  0x14   :  { %v54_v8 = vmul.f32 32.0, %v122_v7  ;;  %vm58_vm1 = vweird.f32 %v122_v7 }
  0x16   :  { %v55_v9 = vsub.f32 1.0, %v54_v8 }
  0x18   :  { %51 = vadd.xlane.f32.xlu0 %v50_v5  ;;  %v56_v10 = vmul.f32 %v122_v7, %v55_v9 }
  0x1a   :  { %v57_v11 = vadd.f32 %v122_v7, %v56_v10 }
  0x1c   :  { %v59_v12 = vsel %vm58_vm1, %v122_v7, %v57_v11 }
  0x83   :  { %v49_v13 = vpop.xlane.xlu0 %48 }
  0x84   :  { %v60_v14 = vmul.f32 %v59_v12, %v49_v13 }
  0x86   :  { %v62_v15 = vadd.f32 1e-06, %v60_v14 }
  0x88   :  { %123 = vrsqrt.f32 %v62_v15  ;;  %vm70_vm3 = vweird.f32 %v62_v15 }
  0x8b   :  { %v52_v16 = vpop.xlane.xlu0 %51 }
  0x8c   :  { %v61_v17 = vmul.f32 %v59_v12, %v52_v16 }
  0x8e   :  { %v124_v18 = vpop.eup %123  ;;  %v63_v19 = vadd.f32 1e-06, %v61_v17 }
  0x8f   :  { %v65_v20 = vmul.f32 %v124_v18, %v62_v15  ;;  %vm71_vm2 = vweird.f32 %v124_v18 }
  0x90   :  { %125 = vrsqrt.f32 %v63_v19  ;;  %vm72_vm4 = vmor %vm70_vm3, %vm71_vm2  ;;  %vm80_vm6 = vweird.f32 %v63_v19 }
  0x91   :  { %v66_v21 = vmul.f32 %v124_v18, %v65_v20 }
  0x93   :  { %v67_v22 = vmul.f32 0.5, %v66_v21 }
  0x95   :  { %v68_v23 = vsub.f32 1.5, %v67_v22 }
  0x96   :  { %v126_v24 = vpop.eup %125 }
  0x97   :  { %v69_v25 = vmul.f32 %v124_v18, %v68_v23  ;;  %v75_v26 = vmul.f32 %v126_v24, %v63_v19  ;;  %vm81_vm5 = vweird.f32 %v126_v24 }
  0x98   :  { %vm82_vm7 = vmor %vm80_vm6, %vm81_vm5 }
  0x99   :  { %v73_v28 = vsel %vm72_vm4, %v124_v18, %v69_v25  ;;  %v76_v29 = vmul.f32 %v126_v24, %v75_v26 }
  0x9a   :  { %v84_v30 = vmul.f32 %v73_v28, %v42_v0 }
  0x9b   :  { %v77_v31 = vmul.f32 0.5, %v76_v29 }
  0x9c   :  { %v90_v32 = vmul.f32 %v120_v27, %v84_v30 }
  0x9d   :  { %v78_v33 = vsub.f32 1.5, %v77_v31 }
  0x9e   :  { %92 = vst.msk [vmem:[#allocation7] sm:$0xff] %vm46_vm0, %v90_v32 }
  0x9f   :  { %v79_v34 = vmul.f32 %v126_v24, %v78_v33 }
  0xa1   :  { %v83_v35 = vsel %vm82_vm7, %v126_v24, %v79_v34 }
  0xa2   :  { %v85_v36 = vmul.f32 %v83_v35, %v43_v2 }
  0xa4   :  { %v91_v37 = vmul.f32 %v120_v27, %v85_v36 }
  0xa6   :  { %93 = vst.msk [vmem:[#allocation7 + $0x8] sm:$0xff] %vm46_vm0, %v91_v37 }
  0xa7   :  { %106 = dma.vmem_to_hbm [thread:$0]  %s99_s1, 256, %s101_s23, [#allocation4], %s206_s17, %s206_s17, %s207_s18  }
  0xa8   :  { %203 = dma.done.wait [#allocation4], 256  }
  0xa9   :  { %204 = vsyncadd [#allocation4], 4294967040 }
  0xaa   :  { %111 = vsyncpa [#allocation3], 1 }
  0xab   :  { %112 = vsyncpa [#allocation6], 1 }
  0xac   :  { %113 = vsyncpa [#allocation4], 1 }

</bundles_post_ra>
